<compile_context>
chip_gen: v7x
topology: tpu7x:2x2x1
jax: 0.10.0
libtpu: 0.0.40
codegen_flags: <defaults>
</compile_context>

<pallas_src>
import functools

import jax
import jax.numpy as jnp
from jax.experimental import pallas as pl
from jax.experimental.pallas import tpu as pltpu


HEADS = 8


def _attention_kernel(x_ref, wqkv_ref, bqkv_ref, wo_ref, bo_ref, o_ref,
                      attn_ref, *, heads):
    # x_ref:    (1, n, dim)  bf16   one batch element per grid step
    # wqkv_ref: (dim, 3*dim) bf16   (1/sqrt(dim) pre-folded)
    # bqkv_ref: (1, 3*dim)   f32    (1/sqrt(dim) pre-folded)
    # wo_ref:   (dim, dim)   bf16
    # bo_ref:   (1, dim)     f32
    # o_ref:    (1, n, dim)  f32
    # attn_ref: (n, dim)     bf16   VMEM scratch (head reassembly)
    _, n, dim = x_ref.shape
    d = dim // heads

    x = x_ref[0]                                                    # (n, dim) bf16

    # QKV projection on the MXU: bf16 x bf16 -> f32 accumulation.
    qkv = jnp.dot(x, wqkv_ref[...], preferred_element_type=jnp.float32)
    qkv = qkv + bqkv_ref[...]                                       # (n, 3*dim) f32

    # PyTorch rearrange 'b n (w h d)' -> w is the slowest index of the 3*dim axis.
    q = qkv[:, 0 * dim:1 * dim]                                     # (n, dim)
    k = qkv[:, 1 * dim:2 * dim]
    v = qkv[:, 2 * dim:3 * dim]

    # Gather heads into a leading batch axis: (heads, n, d), bf16 for the MXU.
    qh = jnp.stack([q[:, h * d:(h + 1) * d] for h in range(heads)],
                   axis=0).astype(jnp.bfloat16)
    kh = jnp.stack([k[:, h * d:(h + 1) * d] for h in range(heads)],
                   axis=0).astype(jnp.bfloat16)
    vh = jnp.stack([v[:, h * d:(h + 1) * d] for h in range(heads)],
                   axis=0).astype(jnp.bfloat16)

    # Batched scores over all heads at once (no explicit transpose): (heads, n, n).
    s = jnp.einsum('hqd,hkd->hqk', qh, kh,
                   preferred_element_type=jnp.float32)
    s = s - jnp.max(s, axis=-1, keepdims=True)
    p = jnp.exp(s)
    p = p * pl.reciprocal(jnp.sum(p, axis=-1, keepdims=True), approx=True)

    # Batched p @ v: (heads, n, d), f32 accumulation.
    o = jnp.einsum('hqk,hkd->hqd', p.astype(jnp.bfloat16), vh,
                   preferred_element_type=jnp.float32)

    # Scatter head outputs back into lane blocks of the scratch (masked vst,
    # replaces the previous 8-way lane concatenate).
    for h in range(heads):
        attn_ref[:, h * d:(h + 1) * d] = o[h].astype(attn_ref.dtype)

    # Output projection (fc1): bf16 x bf16 -> f32 accumulation.
    out = jnp.dot(attn_ref[...], wo_ref[...],
                  preferred_element_type=jnp.float32)
    out = out + bo_ref[...]                                         # (n, dim) f32

    o_ref[...] = out[None, :, :].astype(o_ref.dtype)


def attention_pallas(x, wqkv, bqkv, wo, bo, *, heads=HEADS):
    b, n, dim = x.shape
    scale = float(dim) ** 0.5

    # Fold the module's 1/sqrt(dim) scaling of q, k AND v into the QKV params
    # once, outside the kernel:  (x@W + b)/s == x@(W/s) + b/s.
    wqkv_s = (wqkv * (1.0 / scale)).astype(jnp.bfloat16)
    bqkv_s = (bqkv * (1.0 / scale)).astype(jnp.float32).reshape(1, 3 * dim)
    wo_b = wo.astype(jnp.bfloat16)
    bo2 = bo.astype(jnp.float32).reshape(1, dim)
    x_b = x.astype(jnp.bfloat16)          # halves activation DMA bytes

    kernel = functools.partial(_attention_kernel, heads=heads)
    return pl.pallas_call(
        kernel,
        out_shape=jax.ShapeDtypeStruct((b, n, dim), jnp.float32),
        grid_spec=pltpu.PrefetchScalarGridSpec(
            num_scalar_prefetch=0,
            grid=(b,),
            in_specs=[
                pl.BlockSpec((1, n, dim), lambda i: (i, 0, 0)),
                pl.BlockSpec((dim, 3 * dim), lambda i: (0, 0)),
                pl.BlockSpec((1, 3 * dim), lambda i: (0, 0)),
                pl.BlockSpec((dim, dim), lambda i: (0, 0)),
                pl.BlockSpec((1, dim), lambda i: (0, 0)),
            ],
            out_specs=pl.BlockSpec((1, n, dim), lambda i: (i, 0, 0)),
            scratch_shapes=[pltpu.VMEM((n, dim), jnp.bfloat16)],
        ),
        compiler_params=pltpu.CompilerParams(
            dimension_semantics=("parallel",)),
    )(x_b, wqkv_s, bqkv_s, wo_b, bo2)


def attention_ref(x, wqkv, bqkv, wo, bo, *, heads=HEADS):
    """Pure-JAX f32 reference mirroring the PyTorch forward exactly."""
    b, n, dim = x.shape
    d = dim // heads
    scale = float(dim) ** 0.5
    qkv = x @ wqkv + bqkv                                           # (b, n, 3*dim)
    qkv = qkv / scale
    qkv = qkv.reshape(b, n, 3, heads, d)
    q = jnp.transpose(qkv[:, :, 0], (0, 2, 1, 3))                   # (b, h, n, d)
    k = jnp.transpose(qkv[:, :, 1], (0, 2, 1, 3))
    v = jnp.transpose(qkv[:, :, 2], (0, 2, 1, 3))
    s = jnp.einsum('bhid,bhjd->bhij', q, k)
    p = jax.nn.softmax(s, axis=-1)
    o = jnp.einsum('bhij,bhjd->bhid', p, v)
    o = jnp.transpose(o, (0, 2, 1, 3)).reshape(b, n, dim)
    return o @ wo + bo


def init_params(key, dim):
    """Deterministic init matching the module's init_weights shapes/scheme."""
    k1, k2 = jax.random.split(key)
    # xavier_uniform: bound = sqrt(6 / (fan_in + fan_out))
    b_qkv = (6.0 / (dim + 3 * dim)) ** 0.5
    b_fc1 = (6.0 / (dim + dim)) ** 0.5
    wqkv = jax.random.uniform(k1, (dim, 3 * dim), jnp.float32, -b_qkv, b_qkv)
    wo = jax.random.uniform(k2, (dim, dim), jnp.float32, -b_fc1, b_fc1)
    bqkv = jnp.full((3 * dim,), 0.01, jnp.float32)
    bo = jnp.full((dim,), 0.01, jnp.float32)
    return wqkv, bqkv, wo, bo


if __name__ == "__main__":
    batch, seq, dim = 2, 16, 64   # heads=8 -> head_dim=8

    key = jax.random.PRNGKey(0)
    kx, kp = jax.random.split(key)
    x = jax.random.normal(kx, (batch, seq, dim), jnp.float32)
    wqkv, bqkv, wo, bo = init_params(kp, dim)

    out = attention_pallas(x, wqkv, bqkv, wo, bo)
    out = jax.block_until_ready(out)

    ref = attention_ref(x, wqkv, bqkv, wo, bo)
    assert out.shape == (batch, seq, dim)
    max_err = jnp.max(jnp.abs(out - ref))
    # bf16 MXU operands + approx reciprocal -> compare against f32 ref with a
    # correspondingly looser tolerance.
    assert jnp.allclose(out, ref, atol=2e-2, rtol=2e-2), f"max err {max_err}"

    print("KERNEL_OK")
</pallas_src>

<mosaic_0001>
module attributes {stable_mosaic.version = 11 : i64} {
  func.func @_attention_kernel(%arg0: i32, %arg1: memref<1x16x64xbf16, #tpu.memory_space<vmem>>, %arg2: memref<64x192xbf16, #tpu.memory_space<vmem>>, %arg3: memref<1x192xf32, #tpu.memory_space<vmem>>, %arg4: memref<64x64xbf16, #tpu.memory_space<vmem>>, %arg5: memref<1x64xf32, #tpu.memory_space<vmem>>, %arg6: memref<1x16x64xf32, #tpu.memory_space<vmem>>, %arg7: memref<16x64xbf16, #tpu.memory_space<vmem>>) attributes {dimension_semantics = [#tpu.dimension_semantics<parallel>], iteration_bounds = array<i64: 2>, scalar_prefetch = 0 : i64, scratch_operands = 1 : i64, tpu.core_type = #tpu.core_type<tc>, window_params = [{transform_indices = @transform_0, window_bounds = array<i64: 1, 16, 64>}, {pipeline_mode = #tpu.pipeline_mode<synchronous>, transform_indices = @transform_1, window_bounds = array<i64: 64, 192>}, {pipeline_mode = #tpu.pipeline_mode<synchronous>, transform_indices = @transform_2, window_bounds = array<i64: 1, 192>}, {pipeline_mode = #tpu.pipeline_mode<synchronous>, transform_indices = @transform_3, window_bounds = array<i64: 64, 64>}, {pipeline_mode = #tpu.pipeline_mode<synchronous>, transform_indices = @transform_4, window_bounds = array<i64: 1, 64>}, {transform_indices = @transform_5, window_bounds = array<i64: 1, 16, 64>}]} {
    %c0 = arith.constant 0 : index
    %c0_0 = arith.constant 0 : index
    %c0_1 = arith.constant 0 : index
    %0 = vector.load %arg1[%c0, %c0_0, %c0_1] : memref<1x16x64xbf16, #tpu.memory_space<vmem>>, vector<1x16x64xbf16>
    %1 = vector.shape_cast %0 : vector<1x16x64xbf16> to vector<16x64xbf16>
    %c0_2 = arith.constant 0 : index
    %c0_3 = arith.constant 0 : index
    %2 = vector.load %arg2[%c0_2, %c0_3] : memref<64x192xbf16, #tpu.memory_space<vmem>>, vector<64x192xbf16>
    %cst = arith.constant dense<0.000000e+00> : vector<16x192xf32>
    %3 = tpu.matmul %1, %2, %cst {dimension_numbers = #tpu.dot_dimension_numbers<[1], [0], [0], [1], [0, 0, 1, 1], [], []>} : vector<16x64xbf16>, vector<64x192xbf16>, vector<16x192xf32> -> vector<16x192xf32>
    %c0_4 = arith.constant 0 : index
    %c0_5 = arith.constant 0 : index
    %4 = vector.load %arg3[%c0_4, %c0_5] : memref<1x192xf32, #tpu.memory_space<vmem>>, vector<1x192xf32>
    %5 = vector.broadcast %4 : vector<1x192xf32> to vector<16x192xf32>
    %6 = arith.addf %3, %5 : vector<16x192xf32>
    %7 = vector.extract_strided_slice %6 {offsets = [0, 0], sizes = [16, 64], strides = [1, 1]} : vector<16x192xf32> to vector<16x64xf32>
    %8 = vector.extract_strided_slice %6 {offsets = [0, 64], sizes = [16, 64], strides = [1, 1]} : vector<16x192xf32> to vector<16x64xf32>
    %9 = vector.extract_strided_slice %6 {offsets = [0, 128], sizes = [16, 64], strides = [1, 1]} : vector<16x192xf32> to vector<16x64xf32>
    %10 = vector.extract_strided_slice %7 {offsets = [0, 0], sizes = [16, 8], strides = [1, 1]} : vector<16x64xf32> to vector<16x8xf32>
    %11 = vector.extract_strided_slice %7 {offsets = [0, 8], sizes = [16, 8], strides = [1, 1]} : vector<16x64xf32> to vector<16x8xf32>
    %12 = vector.extract_strided_slice %7 {offsets = [0, 16], sizes = [16, 8], strides = [1, 1]} : vector<16x64xf32> to vector<16x8xf32>
    %13 = vector.extract_strided_slice %7 {offsets = [0, 24], sizes = [16, 8], strides = [1, 1]} : vector<16x64xf32> to vector<16x8xf32>
    %14 = vector.extract_strided_slice %7 {offsets = [0, 32], sizes = [16, 8], strides = [1, 1]} : vector<16x64xf32> to vector<16x8xf32>
    %15 = vector.extract_strided_slice %7 {offsets = [0, 40], sizes = [16, 8], strides = [1, 1]} : vector<16x64xf32> to vector<16x8xf32>
    %16 = vector.extract_strided_slice %7 {offsets = [0, 48], sizes = [16, 8], strides = [1, 1]} : vector<16x64xf32> to vector<16x8xf32>
    %17 = vector.extract_strided_slice %7 {offsets = [0, 56], sizes = [16, 8], strides = [1, 1]} : vector<16x64xf32> to vector<16x8xf32>
    %18 = vector.shape_cast %10 : vector<16x8xf32> to vector<1x16x8xf32>
    %19 = vector.shape_cast %11 : vector<16x8xf32> to vector<1x16x8xf32>
    %20 = vector.shape_cast %12 : vector<16x8xf32> to vector<1x16x8xf32>
    %21 = vector.shape_cast %13 : vector<16x8xf32> to vector<1x16x8xf32>
    %22 = vector.shape_cast %14 : vector<16x8xf32> to vector<1x16x8xf32>
    %23 = vector.shape_cast %15 : vector<16x8xf32> to vector<1x16x8xf32>
    %24 = vector.shape_cast %16 : vector<16x8xf32> to vector<1x16x8xf32>
    %25 = vector.shape_cast %17 : vector<16x8xf32> to vector<1x16x8xf32>
    %26 = tpu.concatenate %18, %19, %20, %21, %22, %23, %24, %25 in 0 : vector<1x16x8xf32>, vector<1x16x8xf32>, vector<1x16x8xf32>, vector<1x16x8xf32>, vector<1x16x8xf32>, vector<1x16x8xf32>, vector<1x16x8xf32>, vector<1x16x8xf32> -> vector<8x16x8xf32>
    %27 = arith.truncf %26 : vector<8x16x8xf32> to vector<8x16x8xbf16>
    %28 = vector.extract_strided_slice %8 {offsets = [0, 0], sizes = [16, 8], strides = [1, 1]} : vector<16x64xf32> to vector<16x8xf32>
    %29 = vector.extract_strided_slice %8 {offsets = [0, 8], sizes = [16, 8], strides = [1, 1]} : vector<16x64xf32> to vector<16x8xf32>
    %30 = vector.extract_strided_slice %8 {offsets = [0, 16], sizes = [16, 8], strides = [1, 1]} : vector<16x64xf32> to vector<16x8xf32>
    %31 = vector.extract_strided_slice %8 {offsets = [0, 24], sizes = [16, 8], strides = [1, 1]} : vector<16x64xf32> to vector<16x8xf32>
    %32 = vector.extract_strided_slice %8 {offsets = [0, 32], sizes = [16, 8], strides = [1, 1]} : vector<16x64xf32> to vector<16x8xf32>
    %33 = vector.extract_strided_slice %8 {offsets = [0, 40], sizes = [16, 8], strides = [1, 1]} : vector<16x64xf32> to vector<16x8xf32>
    %34 = vector.extract_strided_slice %8 {offsets = [0, 48], sizes = [16, 8], strides = [1, 1]} : vector<16x64xf32> to vector<16x8xf32>
    %35 = vector.extract_strided_slice %8 {offsets = [0, 56], sizes = [16, 8], strides = [1, 1]} : vector<16x64xf32> to vector<16x8xf32>
    %36 = vector.shape_cast %28 : vector<16x8xf32> to vector<1x16x8xf32>
    %37 = vector.shape_cast %29 : vector<16x8xf32> to vector<1x16x8xf32>
    %38 = vector.shape_cast %30 : vector<16x8xf32> to vector<1x16x8xf32>
    %39 = vector.shape_cast %31 : vector<16x8xf32> to vector<1x16x8xf32>
    %40 = vector.shape_cast %32 : vector<16x8xf32> to vector<1x16x8xf32>
    %41 = vector.shape_cast %33 : vector<16x8xf32> to vector<1x16x8xf32>
    %42 = vector.shape_cast %34 : vector<16x8xf32> to vector<1x16x8xf32>
    %43 = vector.shape_cast %35 : vector<16x8xf32> to vector<1x16x8xf32>
    %44 = tpu.concatenate %36, %37, %38, %39, %40, %41, %42, %43 in 0 : vector<1x16x8xf32>, vector<1x16x8xf32>, vector<1x16x8xf32>, vector<1x16x8xf32>, vector<1x16x8xf32>, vector<1x16x8xf32>, vector<1x16x8xf32>, vector<1x16x8xf32> -> vector<8x16x8xf32>
    %45 = arith.truncf %44 : vector<8x16x8xf32> to vector<8x16x8xbf16>
    %46 = vector.extract_strided_slice %9 {offsets = [0, 0], sizes = [16, 8], strides = [1, 1]} : vector<16x64xf32> to vector<16x8xf32>
    %47 = vector.extract_strided_slice %9 {offsets = [0, 8], sizes = [16, 8], strides = [1, 1]} : vector<16x64xf32> to vector<16x8xf32>
    %48 = vector.extract_strided_slice %9 {offsets = [0, 16], sizes = [16, 8], strides = [1, 1]} : vector<16x64xf32> to vector<16x8xf32>
    %49 = vector.extract_strided_slice %9 {offsets = [0, 24], sizes = [16, 8], strides = [1, 1]} : vector<16x64xf32> to vector<16x8xf32>
    %50 = vector.extract_strided_slice %9 {offsets = [0, 32], sizes = [16, 8], strides = [1, 1]} : vector<16x64xf32> to vector<16x8xf32>
    %51 = vector.extract_strided_slice %9 {offsets = [0, 40], sizes = [16, 8], strides = [1, 1]} : vector<16x64xf32> to vector<16x8xf32>
    %52 = vector.extract_strided_slice %9 {offsets = [0, 48], sizes = [16, 8], strides = [1, 1]} : vector<16x64xf32> to vector<16x8xf32>
    %53 = vector.extract_strided_slice %9 {offsets = [0, 56], sizes = [16, 8], strides = [1, 1]} : vector<16x64xf32> to vector<16x8xf32>
    %54 = vector.shape_cast %46 : vector<16x8xf32> to vector<1x16x8xf32>
    %55 = vector.shape_cast %47 : vector<16x8xf32> to vector<1x16x8xf32>
    %56 = vector.shape_cast %48 : vector<16x8xf32> to vector<1x16x8xf32>
    %57 = vector.shape_cast %49 : vector<16x8xf32> to vector<1x16x8xf32>
    %58 = vector.shape_cast %50 : vector<16x8xf32> to vector<1x16x8xf32>
    %59 = vector.shape_cast %51 : vector<16x8xf32> to vector<1x16x8xf32>
    %60 = vector.shape_cast %52 : vector<16x8xf32> to vector<1x16x8xf32>
    %61 = vector.shape_cast %53 : vector<16x8xf32> to vector<1x16x8xf32>
    %62 = tpu.concatenate %54, %55, %56, %57, %58, %59, %60, %61 in 0 : vector<1x16x8xf32>, vector<1x16x8xf32>, vector<1x16x8xf32>, vector<1x16x8xf32>, vector<1x16x8xf32>, vector<1x16x8xf32>, vector<1x16x8xf32>, vector<1x16x8xf32> -> vector<8x16x8xf32>
    %63 = arith.truncf %62 : vector<8x16x8xf32> to vector<8x16x8xbf16>
    "tpu.trace_start"() <{level = 10 : i32, message = "hqd,hkd->hqk"}> : () -> ()
    %cst_6 = arith.constant dense<0.000000e+00> : vector<8x16x16xf32>
    %64 = tpu.matmul %27, %45, %cst_6 {dimension_numbers = #tpu.dot_dimension_numbers<[2], [2], [1], [1], [0, 0, 0, 1, 1, 1], [0], [0]>} : vector<8x16x8xbf16>, vector<8x16x8xbf16>, vector<8x16x16xf32> -> vector<8x16x16xf32>
    "tpu.trace_stop"() : () -> ()
    %cst_7 = arith.constant dense<0xFF800000> : vector<8x16xf32>
    %65 = vector.multi_reduction <maximumf>, %64, %cst_7 [2] : vector<8x16x16xf32> to vector<8x16xf32>
    %66 = vector.shape_cast %65 : vector<8x16xf32> to vector<8x16x1xf32>
    %67 = vector.broadcast %66 : vector<8x16x1xf32> to vector<8x16x16xf32>
    %68 = arith.subf %64, %67 : vector<8x16x16xf32>
    %69 = math.exp %68 : vector<8x16x16xf32>
    %cst_8 = arith.constant dense<0.000000e+00> : vector<8x16xf32>
    %70 = vector.multi_reduction <add>, %69, %cst_8 [2] : vector<8x16x16xf32> to vector<8x16xf32>
    %71 = vector.shape_cast %70 : vector<8x16xf32> to vector<8x16x1xf32>
    %72 = tpu.reciprocal %71 {approx = true} : vector<8x16x1xf32> -> vector<8x16x1xf32>
    %73 = vector.broadcast %72 : vector<8x16x1xf32> to vector<8x16x16xf32>
    %74 = arith.mulf %69, %73 : vector<8x16x16xf32>
    %75 = arith.truncf %74 : vector<8x16x16xf32> to vector<8x16x16xbf16>
    "tpu.trace_start"() <{level = 10 : i32, message = "hqk,hkd->hqd"}> : () -> ()
    %cst_9 = arith.constant dense<0.000000e+00> : vector<8x16x8xf32>
    %76 = tpu.matmul %75, %63, %cst_9 {dimension_numbers = #tpu.dot_dimension_numbers<[2], [1], [1], [2], [0, 0, 0, 1, 1, 2], [0], [0]>} : vector<8x16x16xbf16>, vector<8x16x8xbf16>, vector<8x16x8xf32> -> vector<8x16x8xf32>
    "tpu.trace_stop"() : () -> ()
    %77 = vector.extract_strided_slice %76 {offsets = [0, 0, 0], sizes = [1, 16, 8], strides = [1, 1, 1]} : vector<8x16x8xf32> to vector<1x16x8xf32>
    %78 = vector.shape_cast %77 : vector<1x16x8xf32> to vector<16x8xf32>
    %79 = arith.truncf %78 : vector<16x8xf32> to vector<16x8xbf16>
    %c0_10 = arith.constant 0 : index
    %c0_11 = arith.constant 0 : index
    %80 = vector.load %arg7[%c0_10, %c0_11] : memref<16x64xbf16, #tpu.memory_space<vmem>>, vector<16x8xbf16>
    tpu.vector_store %arg7[%c0_10, %c0_11], %79 {strides = array<i32>} : memref<16x64xbf16, #tpu.memory_space<vmem>>, vector<16x8xbf16>,
    %81 = vector.extract_strided_slice %76 {offsets = [1, 0, 0], sizes = [1, 16, 8], strides = [1, 1, 1]} : vector<8x16x8xf32> to vector<1x16x8xf32>
    %82 = vector.shape_cast %81 : vector<1x16x8xf32> to vector<16x8xf32>
    %83 = arith.truncf %82 : vector<16x8xf32> to vector<16x8xbf16>
    %c0_12 = arith.constant 0 : index
    %c8 = arith.constant 8 : index
    %84 = vector.load %arg7[%c0_12, %c8] : memref<16x64xbf16, #tpu.memory_space<vmem>>, vector<16x8xbf16>
    tpu.vector_store %arg7[%c0_12, %c8], %83 {strides = array<i32>} : memref<16x64xbf16, #tpu.memory_space<vmem>>, vector<16x8xbf16>,
    %85 = vector.extract_strided_slice %76 {offsets = [2, 0, 0], sizes = [1, 16, 8], strides = [1, 1, 1]} : vector<8x16x8xf32> to vector<1x16x8xf32>
    %86 = vector.shape_cast %85 : vector<1x16x8xf32> to vector<16x8xf32>
    %87 = arith.truncf %86 : vector<16x8xf32> to vector<16x8xbf16>
    %c0_13 = arith.constant 0 : index
    %c16 = arith.constant 16 : index
    %88 = vector.load %arg7[%c0_13, %c16] : memref<16x64xbf16, #tpu.memory_space<vmem>>, vector<16x8xbf16>
    tpu.vector_store %arg7[%c0_13, %c16], %87 {strides = array<i32>} : memref<16x64xbf16, #tpu.memory_space<vmem>>, vector<16x8xbf16>,
    %89 = vector.extract_strided_slice %76 {offsets = [3, 0, 0], sizes = [1, 16, 8], strides = [1, 1, 1]} : vector<8x16x8xf32> to vector<1x16x8xf32>
    %90 = vector.shape_cast %89 : vector<1x16x8xf32> to vector<16x8xf32>
    %91 = arith.truncf %90 : vector<16x8xf32> to vector<16x8xbf16>
    %c0_14 = arith.constant 0 : index
    %c24 = arith.constant 24 : index
    %92 = vector.load %arg7[%c0_14, %c24] : memref<16x64xbf16, #tpu.memory_space<vmem>>, vector<16x8xbf16>
    tpu.vector_store %arg7[%c0_14, %c24], %91 {strides = array<i32>} : memref<16x64xbf16, #tpu.memory_space<vmem>>, vector<16x8xbf16>,
    %93 = vector.extract_strided_slice %76 {offsets = [4, 0, 0], sizes = [1, 16, 8], strides = [1, 1, 1]} : vector<8x16x8xf32> to vector<1x16x8xf32>
    %94 = vector.shape_cast %93 : vector<1x16x8xf32> to vector<16x8xf32>
    %95 = arith.truncf %94 : vector<16x8xf32> to vector<16x8xbf16>
    %c0_15 = arith.constant 0 : index
    %c32 = arith.constant 32 : index
    %96 = vector.load %arg7[%c0_15, %c32] : memref<16x64xbf16, #tpu.memory_space<vmem>>, vector<16x8xbf16>
    tpu.vector_store %arg7[%c0_15, %c32], %95 {strides = array<i32>} : memref<16x64xbf16, #tpu.memory_space<vmem>>, vector<16x8xbf16>,
    %97 = vector.extract_strided_slice %76 {offsets = [5, 0, 0], sizes = [1, 16, 8], strides = [1, 1, 1]} : vector<8x16x8xf32> to vector<1x16x8xf32>
    %98 = vector.shape_cast %97 : vector<1x16x8xf32> to vector<16x8xf32>
    %99 = arith.truncf %98 : vector<16x8xf32> to vector<16x8xbf16>
    %c0_16 = arith.constant 0 : index
    %c40 = arith.constant 40 : index
    %100 = vector.load %arg7[%c0_16, %c40] : memref<16x64xbf16, #tpu.memory_space<vmem>>, vector<16x8xbf16>
    tpu.vector_store %arg7[%c0_16, %c40], %99 {strides = array<i32>} : memref<16x64xbf16, #tpu.memory_space<vmem>>, vector<16x8xbf16>,
    %101 = vector.extract_strided_slice %76 {offsets = [6, 0, 0], sizes = [1, 16, 8], strides = [1, 1, 1]} : vector<8x16x8xf32> to vector<1x16x8xf32>
    %102 = vector.shape_cast %101 : vector<1x16x8xf32> to vector<16x8xf32>
    %103 = arith.truncf %102 : vector<16x8xf32> to vector<16x8xbf16>
    %c0_17 = arith.constant 0 : index
    %c48 = arith.constant 48 : index
    %104 = vector.load %arg7[%c0_17, %c48] : memref<16x64xbf16, #tpu.memory_space<vmem>>, vector<16x8xbf16>
    tpu.vector_store %arg7[%c0_17, %c48], %103 {strides = array<i32>} : memref<16x64xbf16, #tpu.memory_space<vmem>>, vector<16x8xbf16>,
    %105 = vector.extract_strided_slice %76 {offsets = [7, 0, 0], sizes = [1, 16, 8], strides = [1, 1, 1]} : vector<8x16x8xf32> to vector<1x16x8xf32>
    %106 = vector.shape_cast %105 : vector<1x16x8xf32> to vector<16x8xf32>
    %107 = arith.truncf %106 : vector<16x8xf32> to vector<16x8xbf16>
    %c0_18 = arith.constant 0 : index
    %c56 = arith.constant 56 : index
    %108 = vector.load %arg7[%c0_18, %c56] : memref<16x64xbf16, #tpu.memory_space<vmem>>, vector<16x8xbf16>
    tpu.vector_store %arg7[%c0_18, %c56], %107 {strides = array<i32>} : memref<16x64xbf16, #tpu.memory_space<vmem>>, vector<16x8xbf16>,
    %c0_19 = arith.constant 0 : index
    %c0_20 = arith.constant 0 : index
    %109 = vector.load %arg7[%c0_19, %c0_20] : memref<16x64xbf16, #tpu.memory_space<vmem>>, vector<16x64xbf16>
    %c0_21 = arith.constant 0 : index
    %c0_22 = arith.constant 0 : index
    %110 = vector.load %arg4[%c0_21, %c0_22] : memref<64x64xbf16, #tpu.memory_space<vmem>>, vector<64x64xbf16>
    %cst_23 = arith.constant dense<0.000000e+00> : vector<16x64xf32>
    %111 = tpu.matmul %109, %110, %cst_23 {dimension_numbers = #tpu.dot_dimension_numbers<[1], [0], [0], [1], [0, 0, 1, 1], [], []>} : vector<16x64xbf16>, vector<64x64xbf16>, vector<16x64xf32> -> vector<16x64xf32>
    %c0_24 = arith.constant 0 : index
    %c0_25 = arith.constant 0 : index
    %112 = vector.load %arg5[%c0_24, %c0_25] : memref<1x64xf32, #tpu.memory_space<vmem>>, vector<1x64xf32>
    %113 = vector.broadcast %112 : vector<1x64xf32> to vector<16x64xf32>
    %114 = arith.addf %111, %113 : vector<16x64xf32>
    %115 = vector.shape_cast %114 : vector<16x64xf32> to vector<1x16x64xf32>
    %c0_26 = arith.constant 0 : index
    %c0_27 = arith.constant 0 : index
    %c0_28 = arith.constant 0 : index
    %116 = vector.load %arg6[%c0_26, %c0_27, %c0_28] : memref<1x16x64xf32, #tpu.memory_space<vmem>>, vector<1x16x64xf32>
    tpu.vector_store %arg6[%c0_26, %c0_27, %c0_28], %115 {strides = array<i32>} : memref<1x16x64xf32, #tpu.memory_space<vmem>>, vector<1x16x64xf32>,
    return
  }
  func.func @transform_0(%arg0: i32) -> (i32, i32, i32) {
    %c0_i32 = arith.constant 0 : i32
    %c0_i32_0 = arith.constant 0 : i32
    %c0_i32_1 = arith.constant 0 : i32
    return %arg0, %c0_i32, %c0_i32_0 : i32, i32, i32
  }
  func.func @transform_1(%arg0: i32) -> (i32, i32) {
    %c0_i32 = arith.constant 0 : i32
    %c0_i32_0 = arith.constant 0 : i32
    %c0_i32_1 = arith.constant 0 : i32
    return %c0_i32, %c0_i32_0 : i32, i32
  }
  func.func @transform_2(%arg0: i32) -> (i32, i32) {
    %c0_i32 = arith.constant 0 : i32
    %c0_i32_0 = arith.constant 0 : i32
    %c0_i32_1 = arith.constant 0 : i32
    return %c0_i32, %c0_i32_0 : i32, i32
  }
  func.func @transform_3(%arg0: i32) -> (i32, i32) {
    %c0_i32 = arith.constant 0 : i32
    %c0_i32_0 = arith.constant 0 : i32
    %c0_i32_1 = arith.constant 0 : i32
    return %c0_i32, %c0_i32_0 : i32, i32
  }
  func.func @transform_4(%arg0: i32) -> (i32, i32) {
    %c0_i32 = arith.constant 0 : i32
    %c0_i32_0 = arith.constant 0 : i32
    %c0_i32_1 = arith.constant 0 : i32
    return %c0_i32, %c0_i32_0 : i32, i32
  }
  func.func @transform_5(%arg0: i32) -> (i32, i32, i32) {
    %c0_i32 = arith.constant 0 : i32
    %c0_i32_0 = arith.constant 0 : i32
    %c0_i32_1 = arith.constant 0 : i32
    return %arg0, %c0_i32, %c0_i32_0 : i32, i32, i32
  }
}

</mosaic_0001>

<bundles_post_ra>
// kernel: tpu_custom_call.1
= control target key start
LH: loop header
LB: loop body
LE: loop exit
PB: predicated region body
PF: predicated region fallthrough
CT: control target
= control target key end

     0   :  { %10 = vsyncpa [#allocation4], 0  ;;  %s2863_s0 = inlined_call_operand.hbm [shape: bf16[2,16,64], index: 0, kind: input, shape index: {}]   ;;  %s2864_s1 = inlined_call_operand.hbm [shape: bf16[64,192], index: 1, kind: input, shape index: {}]   ;;  %s2865_s2 = inlined_call_operand.vmem [shape: f32[1,192], index: 2, kind: input, shape index: {}]   ;;  %s2866_s3 = inlined_call_operand.hbm [shape: bf16[64,64], index: 3, kind: input, shape index: {}]   ;;  %s2867_s4 = inlined_call_operand.vmem [shape: f32[1,64], index: 4, kind: input, shape index: {}]   ;;  %s2868_s5 = inlined_call_operand.hbm [shape: f32[2,16,64], index: 5, kind: output, shape index: {}]  }
   0x1   :  { %12 = vsyncpa [#allocation4 + $0x1], 0 }
   0x2   :  { %13 = vsyncpa [#allocation7], 0 }
   0x3   :  { %14 = vsyncpa [#allocation5], 0 }
   0x4   :  { %16 = vsyncpa [#allocation5 + $0x1], 0  ;;  %s2325_s18 = smov 0   ;;  %s2327_s19 = smov 0  }
   0x5   :  { %s2329_s20 = smov 0   ;;  %s2331_s21 = smov 0  }
   0x6 LB: > { %s2346_s22 = sadd.s32 4294967295, %s2266_s21   ;;  %s1672_s23 = sadd.s32 4294967294, %s2266_s21   ;;  %s2266_s21 = sphi %s2331_s21, %s2888_s21   ;;  %s2262_s20 = sphi %s2329_s20, %s2887_s20   ;;  %s2258_s19 = sphi %s2327_s19, %s2886_s19   ;;  %s2254_s18 = sphi %s2325_s18, %s2885_s18  }
   0x7   : > { %p42_p0 = scmp.ne.s32.totalorder %s2258_s19, %s2254_s18  ;;  %p2869_p1 = scmp.eq.s32.totalorder %s2346_s22, 0 }
   0x8   : > { %p156_p3 = scmp.eq.s32.totalorder %s1672_s23, 1  ;;  %p1673_p5 = scmp.ge.s32.totalorder %s2266_s21, 1 }
   0x9   : > { %p2355_p4 = por %p2869_p1, %p42_p0  ;;  %p163_p7 = scmp.lt.s32.totalorder %s2266_s21, 3 }
   0xa   : > { %p2360_p6 = por %p156_p3, %p42_p0  ;;  %s2268_s27 = smov [#allocation6]  }
   0xb   : > { %s2872_s24 = scalar_select %p2355_p4, 1, 0 }
   0xc   : > { %s2873_s25 = scalar_select %p2360_p6, 1, 0 }
   0xd   : > { %p2365_p8 = pnand %p1673_p5, %p163_p7  ;;  %s175_s28 = sshll.u32 %s2268_s27, 4  ;;  %s2369_s28 = int_to_ptr.vmem [resolvable:$true] %s175_s28 }
   0xe   : > { %s2269_s30 = smov [#allocation8]   ;;  %s2110_s9 = scalar_lea.hbm %s2864_s1, 1024 }
   0xf   : > { %p1881_p9 = pneg %p2365_p8  ;;  %s191_s6 = sshll.u32 %s2269_s30, 4  ;;  %s2380_s6 = int_to_ptr.vmem [resolvable:$true] %s191_s6 }
  0x10   : > { %p2111_p12 = scmp.ne.s32.totalorder %s2864_s1, %s2110_s9  ;;  %p2117_p5 = scmp.lt.u32.totalorder %s2110_s9, %s2864_s1 }
  0x11   : > { %p2376_p11 = pnand %p1881_p9, %p2869_p1 }
  0x13   : > { %p2112_p13 = pneg %p2376_p11 }
  0x15   : > { %p2113_p0 = pnand %p2112_p13, %p2111_p12 }
  0x17   : > { %p2114_p3 = pneg %p2113_p0 }
  0x19   : > { %p2119_p7 = pnand %p2117_p5, %p2114_p3 }
  0x1b   : > { %2122 = shalt.err (!%p2119_p7)
}
  0x1c   : > { %s2123_s14 = scalar_lea.vmem %s2369_s28, 1024  ;;  %p2131_p2 = scmp.lt.s32.totalorder %s2369_s28, %s2369_s28 }
  0x1d   : > { %p2124_p9 = scmp.ne.s32.totalorder %s2369_s28, %s2123_s14  ;;  %p2132_p12 = scmp.lt.s32.totalorder %s2123_s14, %s2123_s14 }
  0x1f   : > { %p2126_p10 = pnand %p2124_p9, %p2112_p13  ;;  %p2133_p0 = por %p2132_p12, %p2131_p2 }
  0x21   : > { %p2127_p1 = pneg %p2126_p10 }
  0x23   : > { %p2134_p6 = pnand %p2133_p0, %p2127_p1 }
  0x25   : > { %2137 = shalt.err (!%p2134_p6)
}
  0x26   : > { %s2270_s15 = smov 128   ;;  %s2271_s16 = smov 8  }
  0x27   : > { %1884 = dma.hbm_to_vmem [thread:$0]  (!%p2376_p11), %s2864_s1, 1024, %s2369_s28, [#allocation7], %s2270_s15, %s2270_s15, %s2271_s16  }
  0x28   : > { %s2138_s7 = scalar_lea.hbm %s2866_s3, 512 }
  0x29   : > { %p2139_p2 = scmp.ne.s32.totalorder %s2866_s3, %s2138_s7  ;;  %p2145_p10 = scmp.lt.u32.totalorder %s2138_s7, %s2866_s3 }
  0x2b   : > { %p2141_p1 = pnand %p2139_p2, %p2112_p13 }
  0x2d   : > { %p2142_p6 = pneg %p2141_p1 }
  0x2f   : > { %p2147_p3 = pnand %p2145_p10, %p2142_p6 }
  0x31   : > { %2150 = shalt.err (!%p2147_p3)
}
  0x32   : > { %s2151_s28 = scalar_lea.vmem %s2380_s6, 512  ;;  %p2159_p12 = scmp.lt.s32.totalorder %s2380_s6, %s2380_s6 }
  0x33   : > { %p2152_p5 = scmp.ne.s32.totalorder %s2380_s6, %s2151_s28  ;;  %p2160_p0 = scmp.lt.s32.totalorder %s2151_s28, %s2151_s28 }
  0x35   : > { %p2154_p7 = pnand %p2152_p5, %p2112_p13  ;;  %p2161_p2 = por %p2160_p0, %p2159_p12 }
  0x37   : > { %p2155_p9 = pneg %p2154_p7 }
  0x39   : > { %p2162_p1 = pnand %p2161_p2, %p2155_p9 }
  0x3b   : > { %2165 = shalt.err (!%p2162_p1)
}
  0x3c   : > { %s2272_s12 = smov 64   ;;  %s2273_s13 = smov 4  }
  0x3d   : > { %1887 = dma.hbm_to_vmem [thread:$0]  (!%p2376_p11), %s2866_s3, 512, %s2380_s6, [#allocation7], %s2272_s12, %s2272_s12, %s2273_s13  }
  0x3e   : > { %s2438_s16 = sadd.s32 1, %s2266_s21   ;;  %s29_s23 = sadd.s32 1, %s2262_s20 }
  0x3f   : > { %s26_s17 = ssub.s32 %s2266_s21, %s2438_s16  ;;  %p36_p6 = scmp.ne.s32.totalorder %s2262_s20, %s2258_s19 }
  0x40   : > { %p27_p13 = scmp.eq.s32.totalorder %s26_s17, 0  ;;  %p37_p10 = scmp.eq.s32.totalorder %s2266_s21, 0 }
  0x41   : > { %p2876_p5 = scmp.eq.s32.totalorder %s2346_s22, 1  ;;  %p1898_p9 = scmp.lt.s32.totalorder %s2266_s21, 2 }
  0x42   : > { %s2447_s27 = scalar_select %p27_p13, %s2262_s20, %s29_s23  }
  0x43   : > { %p38_p3 = por %p37_p10, %p36_p6  ;;  %p2451_p7 = por %p2876_p5, %p36_p6 }
  0x44   : > { %s208_s30 = sand.u32 1, %s2262_s20   ;;  %s1722_s6 = sshll.u32 %s2266_s21, 7 }
  0x45   : > { %s2877_s29 = scalar_select %p2451_p7, 1, 0 }
  0x46   : > { %s1677_s7 = sshll.u32 %s208_s30, 3  ;;  %s2461_s10 = scalar_lea.hbm %s2863_s0, %s1722_s6 }
  0x47   : > { %s212_s11 = scalar_lea.vmem [#allocation3], %s1677_s7  ;;  %p2465_p11 = pnand %p1898_p9, %p38_p3 }
  0x48   : > { %s219_s28 = sshll.u32 %s212_s11, 4  ;;  %s2469_s15 = scalar_lea.sflag [#allocation4], %s208_s30  ;;  %s2463_s28 = int_to_ptr.vmem [resolvable:$true] %s219_s28 }
  0x49   : > { %s2166_s17 = scalar_lea.hbm %s2461_s10, 128  ;;  %p2168_p0 = pneg %p2465_p11 }
  0x4a   : > { %p2167_p12 = scmp.ne.s32.totalorder %s2461_s10, %s2166_s17  ;;  %s2171_s6 = scalar_lea.hbm %s2863_s0, 256 }
  0x4b   : > { %p2172_p13 = scmp.lt.u32.totalorder %s2461_s10, %s2863_s0  ;;  %p2173_p6 = scmp.lt.u32.totalorder %s2171_s6, %s2166_s17 }
  0x4c   : > { %p2169_p2 = pnand %p2168_p0, %p2167_p12  ;;  %p2175_p3 = scmp.lt.u32.totalorder %s2166_s17, %s2461_s10 }
  0x4d   : > { %p2174_p10 = por %p2173_p6, %p2172_p13 }
  0x4e   : > { %p2170_p1 = pneg %p2169_p2 }
  0x4f   : > { %p2176_p5 = por %p2175_p3, %p2174_p10 }
  0x51   : > { %p2177_p9 = pnand %p2176_p5, %p2170_p1 }
  0x53   : > { %2180 = shalt.err (!%p2177_p9)
}
  0x54   : > { %s2181_s30 = scalar_lea.vmem %s2463_s28, 128  ;;  %s2274_s11 = smov [#allocation3]  }
  0x55   : > { %p2182_p12 = scmp.ne.s32.totalorder %s2463_s28, %s2181_s30  ;;  %s2186_s23 = sshll.u32 %s2274_s11, 4  ;;  %s2187_s23 = int_to_ptr.vmem [resolvable:$false] %s2186_s23 }
  0x56   : > { %s2188_s7 = scalar_lea.vmem %s2187_s23, 256  ;;  %p2189_p4 = scmp.lt.s32.totalorder %s2463_s28, %s2187_s23 }
  0x57   : > { %p2184_p2 = pnand %p2182_p12, %p2168_p0  ;;  %p2190_p13 = scmp.lt.s32.totalorder %s2188_s7, %s2181_s30 }
  0x59   : > { %p2185_p7 = pneg %p2184_p2  ;;  %p2191_p6 = por %p2190_p13, %p2189_p4 }
  0x5b   : > { %p2192_p10 = pnand %p2191_p6, %p2185_p7 }
  0x5d   : > { %2195 = shalt.err (!%p2192_p10)
}
  0x5e   : > { %1891 = dma.hbm_to_vmem [thread:$0]  (!%p2465_p11), %s2461_s10, 128, %s2463_s28, %s2469_s15, %s2272_s12, %s2272_s12, %s2273_s13  }
  0x5f   : > { %231 = sbr.rel (%p2365_p8) target bundleno = 1768 (0x6e8), region = 40  ;;  %s2503_s17 = sand.u32 (!%p2365_p8), 1, %s2258_s19  }
  0x60   : > { %s1681_s6 = sshll.u32 (!%p2365_p8), %s2503_s17, 3  ;;  %s234_s8 = scalar_lea.sflag (!%p2365_p8), [#allocation4], %s2503_s17 }
  0x61   : > { %s237_s9 = scalar_lea.vmem (!%p2365_p8), [#allocation3], %s1681_s6  ;;  %p2879_p4 = scmp.ne.s32.totalorder (!%p2365_p8), %s2872_s24, 0 }
  0x66   : > { %2241 = dma.done.wait (%p2879_p4), %s234_s8, 128  }
  0x67   : > { %2243 = vsyncadd (%p2879_p4), %s234_s8, 4294967168  ;;  %p2880_p7 = scmp.eq.s32.totalorder %s2346_s22, 0 }
  0x69   : > { %2245 = dma.done.wait (%p2880_p7), [#allocation7], 1536   ;;  %p2881_p11 = pmov %p2880_p7 }
  0x6a   : > { %v2275_v0 = vmov 0   ;;  %v2029_v1 = vld [vmem:[#allocation6 + $0x4] ss:$8 sps:$4 sm:$0xff]   ;;  %v2031_v2 = vld [vmem:[#allocation6] ss:$8 sps:$4 sm:$0xff]   ;;  %v2041_v9 = vld [vmem:[%s237_s9] sm:$0xff]   ;;  %v285_v10 = vlaneseq }
  0x6b   : > { %2247 = vsyncadd (%p2881_p11), [#allocation7], 4294965760  ;;  %376 = vmatprep.mubr.bf16.mxu0 %v2275_v0  ;;  %344 = vmatprep.subr.bf16.mxu0 %v2029_v1  ;;  %v2032_v3 = vld [vmem:[#allocation6 + $0x14] ss:$8 sps:$4 sm:$0xff]   ;;  %v2034_v4 = vld [vmem:[#allocation6 + $0x10] ss:$8 sps:$4 sm:$0xff]  }
  0x6c   : > { %345 = vmatpush1.bf16.msra.mxu0 %v2031_v2  ;;  %v2035_v5 = vld [vmem:[#allocation6 + $0x24] ss:$8 sps:$4 sm:$0xff]   ;;  %v2037_v6 = vld [vmem:[#allocation6 + $0x20] ss:$8 sps:$4 sm:$0xff]   ;;  %v2038_v7 = vld [vmem:[#allocation6 + $0x34] ss:$8 sps:$4 sm:$0xff]  }
  0x6d   : > { %346 = vmatprep.subr.bf16.mxu0 %v2032_v3  ;;  %v2040_v8 = vld [vmem:[#allocation6 + $0x30] ss:$8 sps:$4 sm:$0xff]   ;;  %vm340_vm0 = vcmask 523264   ;;  %v286_v11 = vshrl.u32 %v285_v10, 7  ;;  %v283_v13 = vld [vmem:[%s2865_s2] sm:$0x3] }
  0x6e   : > { %s2276_s12 = smov 104   ;;  %s2277_s13 = smov 120   ;;  %v2278_v28 = vmov 0.0   ;;  %vm2281_vm1 = vmmov 0   ;;  %vm494_vm2 = vcmask 64512   ;;  %vm892_vm3 = vcmask 130048  }
  0x6f   : > { %v287_v12 = vsub.s32 0, %v286_v11  ;;  %v291_v14 = vsub.s32 1, %v286_v11  ;;  %1761 = vmatprep.subr.bf16.mxu1 %v2278_v28  ;;  %s2279_s10 = smov 96   ;;  %s2280_s28 = smov 112   ;;  %1763 = vmatprep.mubr.msk.bf16.mxu1 %vm2281_vm1, %v2278_v28  ;;  %vm1436_vm4 = vcmask 130112   ;;  %vm1443_vm5 = vcmask 195712  }
  0x70   : > { %347 = vmatpush1.bf16.msra.mxu0 %v2034_v4  ;;  %s2282_s14 = smov 80   ;;  %s2283_s15 = smov 88   ;;  %vm1450_vm6 = vcmask 261312   ;;  %vm1457_vm7 = vcmask 326912   ;;  %vm1464_vm8 = vcmask 392512   ;;  %vm1471_vm9 = vcmask 458112  }
  0x71   : > { %348 = vmatprep.subr.bf16.mxu0 %v2035_v5  ;;  %v288_v15 = vrot.slane %v283_v13, %v287_v12  ;;  %v292_v17 = vrot.slane %v283_v13, %v291_v14  ;;  %s2284_s30 = smov 72   ;;  %s2285_s11 = smov 64   ;;  %vm1478_vm10 = vcmask 523712  }
  0x72   : > { %s2286_s23 = smov 8   ;;  %s2287_s7 = smov 16  }
  0x73   : > { %s2288_s6 = smov 32   ;;  %s2289_s8 = smov 48  }
  0x74   : > { %349 = vmatpush1.bf16.msra.mxu0 %v2037_v6  ;;  %s2290_s9 = smov 24   ;;  %s2291_s24 = smov 40  }
  0x75   : > { %350 = vmatprep.subr.bf16.mxu0 %v2038_v7  ;;  %s2292_s26 = smov 56   ;;  %p2882_p0 = scmp.ne.s32.totalorder %s2877_s29, 0 }
  0x78   : > { %351 = vmatpush1.bf16.msra.mxu0 %v2040_v8 }
  0x79   : > { %1785 = vmatprep.subr.bf16.mxu0 %v2278_v28 }
  0x7b   : > { %1694 = vmatmul.mubr.msk.bf16.vlgmr.msra.gmra.mrb[0].mxu0 %vm340_vm0, %v2041_v9 }
  0x7c   : > { %1787 = vmatprep.mubr.msk.bf16.mxu0 %vm2281_vm1, %v2278_v28 }
 0x14e   : > { %v378_v16 = vpop.f32.mrb[0].mxu0 }
 0x14f   : > { %v380_v18 = vpop.f32.mrb[1].mxu0  ;;  %v379_v20 = vadd.f32 %v378_v16, %v288_v15 }
 0x150   : > { %v382_v19 = vpop.f32.mrb[2].mxu0  ;;  %v2519_v23 = vadd.f32 %v380_v18, %v292_v17 }
 0x151   : > { %v383_v21 = vadd.f32 %v382_v19, %v288_v15  ;;  %v384_v22 = vpop.f32.mrb[3].mxu0 }
 0x152   : > { %v2521_v24 = vadd.f32 %v384_v22, %v292_v17 }
 0x153   : > { %v1969_v25 = vpack.i.bf16 %v383_v21, %v379_v20  ;;  %v2523_v26 = vpack.c.bf16 %v383_v21, %v379_v20 }
 0x154   : > { %v2529_v27 = vpack.i.bf16 %v2521_v24, %v2519_v23  ;;  %v483_v29 = vpack.c.bf16 %v2521_v24, %v2519_v23 }
 0x155   : > { %1970 = vrot.lane.b32.xlu1 %v1969_v25, %s2276_s12  ;;  %1960 = vrot.lane.b32.xlu0 %v1969_v25, %s2277_s13 }
 0x159   : > { %1975 = vrot.lane.b32.xlu1 %v1969_v25, %s2279_s10  ;;  %1965 = vrot.lane.b32.xlu0 %v1969_v25, %s2280_s28 }
 0x15d   : > { %1985 = vrot.lane.b32.xlu1 %v1969_v25, %s2282_s14  ;;  %1980 = vrot.lane.b32.xlu0 %v1969_v25, %s2283_s15 }
 0x161   : > { %1990 = vrot.lane.b32.xlu0 %v1969_v25, %s2284_s30  ;;  %492 = vrot.lane.b32.xlu1 %v2523_v26, %s2285_s11 }
 0x1c7   : > { %v1971_v30 = vpop.permute.xlu1 %1970  ;;  %v1961_v31 = vpop.permute.xlu0 %1960 }
 0x1c8   : > { %v1963_v32 = vunpack.i.h.bf16 %v1961_v31  ;;  %v1962_v33 = vunpack.i.l.bf16 %v1961_v31  ;;  %v1973_v34 = vunpack.i.h.bf16 %v1971_v30  ;;  %v1972_v35 = vunpack.i.l.bf16 %v1971_v30 }
 0x1ca   : > { %v432_v36 = vpack.c.bf16 %v1963_v32, %v1962_v33  ;;  %v434_v41 = vpack.c.bf16 %v1973_v34, %v1972_v35 }
 0x1cb   : > { %v1976_v37 = vpop.permute.xlu1 %1975  ;;  %v1966_v38 = vpop.permute.xlu0 %1965 }
 0x1cc   : > { %v1968_v39 = vunpack.i.h.bf16 %v1966_v38  ;;  %v1967_v40 = vunpack.i.l.bf16 %v1966_v38  ;;  %543 = vrot.lane.b32.xlu0 %v432_v36, %s2285_s11  ;;  %v1978_v42 = vunpack.i.h.bf16 %v1976_v37  ;;  %v1977_v43 = vunpack.i.l.bf16 %v1976_v37 }
 0x1ce   : > { %v433_v44 = vpack.c.bf16 %v1968_v39, %v1967_v40  ;;  %v435_v49 = vpack.c.bf16 %v1978_v42, %v1977_v43 }
 0x1cf   : > { %v1986_v45 = vpop.permute.xlu1 %1985  ;;  %v1981_v46 = vpop.permute.xlu0 %1980 }
 0x1d0   : > { %v1983_v47 = vunpack.i.h.bf16 %v1981_v46  ;;  %v1982_v48 = vunpack.i.l.bf16 %v1981_v46  ;;  %643 = vrot.lane.b32.xlu0 %v434_v41, %s2285_s11  ;;  %593 = vrot.lane.b32.xlu1 %v433_v44, %s2285_s11  ;;  %v1988_v50 = vunpack.i.h.bf16 %v1986_v45  ;;  %v1987_v51 = vunpack.i.l.bf16 %v1986_v45 }
 0x1d2   : > { %v436_v52 = vpack.c.bf16 %v1983_v47, %v1982_v48  ;;  %v437_v58 = vpack.c.bf16 %v1988_v50, %v1987_v51 }
 0x1d3   : > { %v1991_v53 = vpop.permute.xlu0 %1990  ;;  %v493_v54 = vpop.permute.xlu1 %492 }
 0x1d4   : > { %v1993_v55 = vunpack.i.h.bf16 %v1991_v53  ;;  %v1992_v56 = vunpack.i.l.bf16 %v1991_v53  ;;  %743 = vrot.lane.b32.xlu0 %v436_v52, %s2285_s11  ;;  %693 = vrot.lane.b32.xlu1 %v435_v49, %s2285_s11  ;;  %v499_v57 = vsel %vm494_vm2, %v493_v54, 0 }
 0x1d5   : > { %1762 = vmatpush3.bf16.xpose.msra.mxu1 %v499_v57 }
 0x1d6   : > { %v438_v59 = vpack.c.bf16 %v1993_v55, %v1992_v56  ;;  %1767 = vmatprep.subr.bf16.mxu1 %v2278_v28 }
 0x1d8   : > { %843 = vrot.lane.b32.xlu0 %v438_v59, %s2285_s11  ;;  %793 = vrot.lane.b32.xlu1 %v437_v58, %s2285_s11 }
 0x1dc   : > { %1995 = vrot.lane.b32.xlu0 %v2529_v27, %s2277_s13  ;;  %2000 = vrot.lane.b32.xlu1 %v2529_v27, %s2280_s28 }
 0x1dd   : > { %1764 = vmatmul.mubr.msk.bf16.vlgmr.msra.gmra.mrb[0].mxu1 %vm494_vm2, %v2523_v26 }
 0x1de   : > { %1769 = vmatprep.mubr.msk.bf16.mxu1 %vm2281_vm1, %v2278_v28 }
 0x23e   : > { %v544_v60 = vpop.permute.xlu0 %543 }
 0x23f   : > { %v549_v61 = vsel %vm494_vm2, %v544_v60, 0 }
 0x240   : > { %1768 = vmatpush3.bf16.xpose.msra.mxu1 %v549_v61 }
 0x241   : > { %1773 = vmatprep.subr.bf16.mxu1 %v2278_v28 }
 0x242   : > { %v594_v62 = vpop.permute.xlu1 %593  ;;  %v644_v2 = vpop.permute.xlu0 %643 }
 0x243   : > { %v599_v0 = vsel %vm494_vm2, %v594_v62, 0  ;;  %v649_v4 = vsel %vm494_vm2, %v644_v2, 0 }
 0x246   : > { %v694_v63 = vpop.permute.xlu1 %693  ;;  %v744_v6 = vpop.permute.xlu0 %743 }
 0x247   : > { %v699_v1 = vsel %vm494_vm2, %v694_v63, 0  ;;  %1770 = vmatmul.mubr.msk.bf16.vlgmr.msra.gmra.mrb[4].mxu1 %vm494_vm2, %v432_v36  ;;  %v749_v7 = vsel %vm494_vm2, %v744_v6, 0 }
 0x248   : > { %1774 = vmatpush3.bf16.xpose.msra.mxu1 %v599_v0  ;;  %1786 = vmatpush3.bf16.xpose.msra.mxu0 %v699_v1 }
 0x249   : > { %1775 = vmatprep.mubr.msk.bf16.mxu1 %vm2281_vm1, %v2278_v28  ;;  %1779 = vmatprep.subr.bf16.mxu1 %v2278_v28 }
 0x24a   : > { %1797 = vmatprep.subr.bf16.mxu0 %v2278_v28  ;;  %v794_v3 = vpop.permute.xlu1 %793  ;;  %v844_v8 = vpop.permute.xlu0 %843 }
 0x24b   : > { %v799_v5 = vsel %vm494_vm2, %v794_v3, 0  ;;  %v849_v9 = vsel %vm494_vm2, %v844_v8, 0 }
 0x24e   : > { %v1996_v10 = vpop.permute.xlu0 %1995 }
 0x24f   : > { %1776 = vmatmul.mubr.msk.bf16.vlgmr.msra.gmra.mrb[8].mxu1 %vm494_vm2, %v433_v44  ;;  %1788 = vmatmul.mubr.msk.bf16.vlgmr.msra.gmra.mrb[4].mxu0 %vm494_vm2, %v435_v49  ;;  %v1998_v11 = vunpack.i.h.bf16 %v1996_v10  ;;  %v1997_v12 = vunpack.i.l.bf16 %v1996_v10 }
 0x250   : > { %1780 = vmatpush3.bf16.xpose.msra.mxu1 %v649_v4  ;;  %1798 = vmatpush3.bf16.xpose.msra.mxu0 %v799_v5  ;;  %v2670_v5 = vpop.permute.xlu1 %2000 }
 0x251   : > { %1781 = vmatprep.mubr.msk.bf16.mxu1 %vm2281_vm1, %v2278_v28  ;;  %1799 = vmatprep.mubr.msk.bf16.mxu0 %vm2281_vm1, %v2278_v28  ;;  %v484_v13 = vpack.c.bf16 %v1998_v11, %v1997_v12 }
 0x252   : > { %1791 = vmatprep.subr.bf16.mxu1 %v2278_v28  ;;  %1809 = vmatprep.subr.bf16.mxu0 %v2278_v28 }
 0x257   : > { %1782 = vmatmul.mubr.msk.bf16.vlgmr.msra.gmra.mrb[12].mxu1 %vm494_vm2, %v434_v41  ;;  %1800 = vmatmul.mubr.msk.bf16.vlgmr.msra.gmra.mrb[8].mxu0 %vm494_vm2, %v437_v58 }
 0x258   : > { %1792 = vmatpush3.bf16.xpose.msra.mxu1 %v749_v7  ;;  %1810 = vmatpush3.bf16.msra.mxu0 %v483_v29 }
 0x259   : > { %1793 = vmatprep.mubr.msk.bf16.mxu1 %vm2281_vm1, %v2278_v28  ;;  %1803 = vmatprep.subr.bf16.mxu1 %v2278_v28 }
 0x25a   : > { %1811 = vmatprep.mubr.msk.bf16.mxu0 %vm2281_vm1, %v2278_v28  ;;  %1821 = vmatprep.subr.bf16.mxu0 %v2278_v28 }
 0x25f   : > { %1794 = vmatmul.mubr.msk.bf16.vlgmr.msra.gmra.mrb[16].mxu1 %vm494_vm2, %v436_v52 }
 0x260   : > { %1804 = vmatpush3.bf16.xpose.msra.mxu1 %v849_v9  ;;  %1805 = vmatprep.mubr.msk.bf16.mxu1 %vm2281_vm1, %v2278_v28 }
 0x261   : > { %1815 = vmatprep.subr.bf16.mxu1 %v2278_v28 }
 0x267   : > { %1806 = vmatmul.mubr.msk.bf16.vlgmr.msra.gmra.mrb[20].mxu1 %vm494_vm2, %v438_v59 }
 0x268   : > { %1816 = vmatpush3.bf16.msra.mxu1 %v484_v13  ;;  %1817 = vmatprep.mubr.msk.bf16.mxu1 %vm2281_vm1, %v2278_v28 }
 0x269   : > { %1827 = vmatprep.subr.bf16.mxu1 %v2278_v28 }
 0x2b0   : > { %v2603_v14 = vpop.f32.mrb[0].mxu1 }
 0x2b1   : > { %v1765_v15 = vpop.f32.mrb[1].mxu1  ;;  %v893_v16 = vsel %vm892_vm3, %v2603_v14, -inf }
 0x2b2   : > { %894 = vmax.xlane.f32.xlu1 %v893_v16  ;;  %v538_v17 = vpop.f32.mrb[2].mxu1 }
 0x2b3   : > { %v1766_v18 = vpop.f32.mrb[3].mxu1  ;;  %v896_v19 = vsel %vm892_vm3, %v538_v17, -inf }
 0x2b4   : > { %897 = vmax.xlane.f32.xlu0 %v896_v19 }
 0x31a   : > { %v2608_v20 = vpop.f32.mrb[4].mxu1 }
 0x31b   : > { %v1771_v21 = vpop.f32.mrb[5].mxu1  ;;  %v899_v22 = vsel %vm892_vm3, %v2608_v20, -inf }
 0x31c   : > { %900 = vmax.xlane.f32.xlu0 %v899_v22  ;;  %v2612_v23 = vpop.f32.mrb[6].mxu1 }
 0x31d   : > { %v1772_v24 = vpop.f32.mrb[7].mxu1  ;;  %v902_v25 = vsel %vm892_vm3, %v2612_v23, -inf }
 0x31e   : > { %903 = vmax.xlane.f32.xlu1 %v902_v25 }
 0x322   : > { %v2616_v26 = vpop.f32.mrb[8].mxu1  ;;  %v2618_v29 = vpop.f32.mrb[4].mxu0 }
 0x323   : > { %v1777_v30 = vpop.f32.mrb[9].mxu1  ;;  %v1789_v31 = vpop.f32.mrb[5].mxu0  ;;  %v917_v32 = vsel %vm892_vm3, %v2618_v29, -inf  ;;  %v905_v38 = vsel %vm892_vm3, %v2616_v26, -inf }
 0x324   : > { %v2622_v33 = vpop.f32.mrb[10].mxu1  ;;  %918 = vmax.xlane.f32.xlu0 %v917_v32  ;;  %v2624_v34 = vpop.f32.mrb[6].mxu0 }
 0x325   : > { %v1778_v35 = vpop.f32.mrb[11].mxu1  ;;  %v1790_v36 = vpop.f32.mrb[7].mxu0  ;;  %v920_v37 = vsel %vm892_vm3, %v2624_v34, -inf  ;;  %v908_v39 = vsel %vm892_vm3, %v2622_v33, -inf }
 0x326   : > { %921 = vmax.xlane.f32.xlu1 %v920_v37 }
 0x328   : > { %906 = vmax.xlane.f32.xlu0 %v905_v38 }
 0x32a   : > { %v2632_v40 = vpop.f32.mrb[12].mxu1  ;;  %909 = vmax.xlane.f32.xlu1 %v908_v39  ;;  %v2634_v41 = vpop.f32.mrb[8].mxu0 }
 0x32b   : > { %v1783_v42 = vpop.f32.mrb[13].mxu1  ;;  %v1801_v43 = vpop.f32.mrb[9].mxu0  ;;  %v929_v44 = vsel %vm892_vm3, %v2634_v41, -inf  ;;  %v911_v50 = vsel %vm892_vm3, %v2632_v40, -inf }
 0x32c   : > { %v2638_v45 = vpop.f32.mrb[14].mxu1  ;;  %930 = vmax.xlane.f32.xlu0 %v929_v44  ;;  %v2640_v46 = vpop.f32.mrb[10].mxu0 }
 0x32d   : > { %v1784_v47 = vpop.f32.mrb[15].mxu1  ;;  %v1802_v48 = vpop.f32.mrb[11].mxu0  ;;  %v932_v49 = vsel %vm892_vm3, %v2640_v46, -inf  ;;  %v914_v51 = vsel %vm892_vm3, %v2638_v45, -inf }
 0x32e   : > { %933 = vmax.xlane.f32.xlu1 %v932_v49 }
 0x330   : > { %912 = vmax.xlane.f32.xlu0 %v911_v50 }
 0x332   : > { %v2648_v52 = vpop.f32.mrb[16].mxu1  ;;  %915 = vmax.xlane.f32.xlu1 %v914_v51 }
 0x333   : > { %v1795_v53 = vpop.f32.mrb[17].mxu1  ;;  %v923_v54 = vsel %vm892_vm3, %v2648_v52, -inf }
 0x334   : > { %v2652_v55 = vpop.f32.mrb[18].mxu1  ;;  %924 = vmax.xlane.f32.xlu0 %v923_v54 }
 0x335   : > { %v1796_v56 = vpop.f32.mrb[19].mxu1  ;;  %v926_v57 = vsel %vm892_vm3, %v2652_v55, -inf }
 0x336   : > { %927 = vmax.xlane.f32.xlu1 %v926_v57 }
 0x33a   : > { %v2656_v58 = vpop.f32.mrb[20].mxu1 }
 0x33b   : > { %v1807_v59 = vpop.f32.mrb[21].mxu1  ;;  %v935_v60 = vsel %vm892_vm3, %v2656_v58, -inf }
 0x33c   : > { %v2660_v61 = vpop.f32.mrb[22].mxu1  ;;  %936 = vmax.xlane.f32.xlu0 %v935_v60 }
 0x33d   : > { %v1808_v62 = vpop.f32.mrb[23].mxu1  ;;  %v938_v63 = vsel %vm892_vm3, %v2660_v61, -inf }
 0x33e   : > { %939 = vmax.xlane.f32.xlu1 %v938_v63 }
 0x33f   : > { %v895_v6 = vpop.xlane.xlu1 %894 }
 0x340   : > { %v941_v7 = vsub.f32 %v2603_v14, %v895_v6 }
 0x341   : > { %v898_v0 = vpop.xlane.xlu0 %897 }
 0x342   : > { %v942_v1 = vsub.f32 %v538_v17, %v898_v0  ;;  %v957_v8 = vmul.f32 1.442695, %v941_v7 }
 0x344   : > { %v959_v2 = vmul.f32 1.442695, %v942_v1 }
 0x346   : > { %2046 = vpow2.f32 %v959_v2 }
 0x347   : > { %2048 = vpow2.f32 %v957_v8 }
 0x350   : > { %v2664_v3 = vpop.eup %2046 }
 0x351   : > { %v992_v4 = vsel %vm892_vm3, %v2664_v3, 0.0  ;;  %v2673_v9 = vpop.eup %2048 }
 0x352   : > { %993 = vadd.xlane.f32.xlu1 %v992_v4  ;;  %2005 = vrot.lane.b32.xlu0 %v2529_v27, %s2276_s12  ;;  %v989_v10 = vsel %vm892_vm3, %v2673_v9, 0.0  ;;  %s1684_s12 = sshll.u32 %s2503_s17, 4 }
 0x353   : > { %s271_s28 = scalar_lea.vmem [#allocation9], %s1684_s12 }
 0x371   : > { %990 = vadd.xlane.f32.xlu0 %v989_v10 }
 0x3a9   : > { %v901_v11 = vpop.xlane.xlu0 %900 }
 0x3aa   : > { %v943_v12 = vsub.f32 %v2608_v20, %v901_v11 }
 0x3ab   : > { %v904_v13 = vpop.xlane.xlu1 %903 }
 0x3ac   : > { %v961_v15 = vmul.f32 1.442695, %v943_v12  ;;  %v944_v16 = vsub.f32 %v2612_v23, %v904_v13 }
 0x3ae   : > { %2050 = vpow2.f32 %v961_v15  ;;  %v963_v17 = vmul.f32 1.442695, %v944_v16 }
 0x3b0   : > { %2052 = vpow2.f32 %v963_v17 }
 0x3b1   : > { %v919_v18 = vpop.xlane.xlu0 %918 }
 0x3b2   : > { %v949_v14 = vsub.f32 %v2618_v29, %v919_v18 }
 0x3b3   : > { %v922_v19 = vpop.xlane.xlu1 %921 }
 0x3b4   : > { %v973_v21 = vmul.f32 1.442695, %v949_v14  ;;  %v950_v22 = vsub.f32 %v2624_v34, %v922_v19 }
 0x3b5   : > { %v907_v24 = vpop.xlane.xlu0 %906 }
 0x3b6   : > { %2054 = vpow2.f32 %v973_v21  ;;  %v975_v25 = vmul.f32 1.442695, %v950_v22  ;;  %v945_v30 = vsub.f32 %v2616_v26, %v907_v24 }
 0x3b7   : > { %v910_v20 = vpop.xlane.xlu1 %909 }
 0x3b8   : > { %v2682_v31 = vpop.eup %2050  ;;  %2056 = vpow2.f32 %v975_v25  ;;  %v965_v23 = vmul.f32 1.442695, %v945_v30  ;;  %v946_v32 = vsub.f32 %v2622_v33, %v910_v20 }
 0x3b9   : > { %v931_v35 = vpop.xlane.xlu0 %930  ;;  %v995_v29 = vsel %vm892_vm3, %v2682_v31, 0.0 }
 0x3ba   : > { %v2687_v36 = vpop.eup %2052  ;;  %2058 = vpow2.f32 %v965_v23  ;;  %v967_v34 = vmul.f32 1.442695, %v946_v32  ;;  %v953_v37 = vsub.f32 %v2634_v41, %v931_v35  ;;  %996 = vadd.xlane.f32.xlu0 %v995_v29  ;;  %v2003_v23 = vunpack.i.h.bf16 %v2670_v5 }
 0x3bb   : > { %v934_v38 = vpop.xlane.xlu1 %933  ;;  %v998_v26 = vsel %vm892_vm3, %v2687_v36, 0.0  ;;  %v2002_v32 = vunpack.i.l.bf16 %v2670_v5 }
 0x3bc   : > { %2060 = vpow2.f32 %v967_v34  ;;  %v981_v39 = vmul.f32 1.442695, %v953_v37  ;;  %v954_v42 = vsub.f32 %v2640_v46, %v934_v38  ;;  %999 = vadd.xlane.f32.xlu1 %v998_v26 }
 0x3bd   : > { %v913_v33 = vpop.xlane.xlu0 %912  ;;  %v485_v38 = vpack.c.bf16 %v2003_v23, %v2002_v32 }
 0x3be   : > { %2062 = vpow2.f32 %v981_v39  ;;  %v983_v43 = vmul.f32 1.442695, %v954_v42  ;;  %v947_v44 = vsub.f32 %v2632_v40, %v913_v33 }
 0x3bf   : > { %v916_v63 = vpop.xlane.xlu1 %915 }
 0x3c0   : > { %v2694_v47 = vpop.eup %2054  ;;  %2064 = vpow2.f32 %v983_v43  ;;  %v969_v48 = vmul.f32 1.442695, %v947_v44  ;;  %v948_v1 = vsub.f32 %v2638_v45, %v916_v63 }
 0x3c1   : > { %v1013_v41 = vsel %vm892_vm3, %v2694_v47, 0.0  ;;  %v925_v0 = vpop.xlane.xlu0 %924 }
 0x3c2   : > { %v2698_v49 = vpop.eup %2056  ;;  %2066 = vpow2.f32 %v969_v48  ;;  %1014 = vadd.xlane.f32.xlu0 %v1013_v41  ;;  %v951_v4 = vsub.f32 %v2648_v52, %v925_v0  ;;  %v971_v6 = vmul.f32 1.442695, %v948_v1 }
 0x3c3   : > { %v1016_v46 = vsel %vm892_vm3, %v2698_v49, 0.0  ;;  %v928_v2 = vpop.xlane.xlu1 %927 }
 0x3c4   : > { %v2702_v50 = vpop.eup %2058  ;;  %1017 = vadd.xlane.f32.xlu1 %v1016_v46  ;;  %v952_v7 = vsub.f32 %v2652_v55, %v928_v2  ;;  %v977_v10 = vmul.f32 1.442695, %v951_v4  ;;  %2068 = vpow2.f32 %v971_v6 }
 0x3c5   : > { %v1001_v40 = vsel %vm892_vm3, %v2702_v50, 0.0 }
 0x3c6   : > { %v2706_v51 = vpop.eup %2060  ;;  %1002 = vadd.xlane.f32.xlu0 %v1001_v40  ;;  %v979_v11 = vmul.f32 1.442695, %v952_v7  ;;  %2070 = vpow2.f32 %v977_v10 }
 0x3c7   : > { %v1004_v53 = vsel %vm892_vm3, %v2706_v51, 0.0 }
 0x3c8   : > { %v2710_v54 = vpop.eup %2062  ;;  %1005 = vadd.xlane.f32.xlu1 %v1004_v53  ;;  %2072 = vpow2.f32 %v979_v11 }
 0x3c9   : > { %v1025_v56 = vsel %vm892_vm3, %v2710_v54, 0.0  ;;  %v937_v8 = vpop.xlane.xlu0 %936 }
 0x3ca   : > { %v2714_v57 = vpop.eup %2064  ;;  %1026 = vadd.xlane.f32.xlu0 %v1025_v56  ;;  %v955_v12 = vsub.f32 %v2656_v58, %v937_v8 }
 0x3cb   : > { %v1028_v59 = vsel %vm892_vm3, %v2714_v57, 0.0  ;;  %v940_v13 = vpop.xlane.xlu1 %939 }
 0x3cc   : > { %v2718_v60 = vpop.eup %2066  ;;  %1029 = vadd.xlane.f32.xlu1 %v1028_v59  ;;  %v956_v15 = vsub.f32 %v2660_v61, %v940_v13  ;;  %v985_v16 = vmul.f32 1.442695, %v955_v12 }
 0x3cd   : > { %v1007_v62 = vsel %vm892_vm3, %v2718_v60, 0.0  ;;  %v2006_v45 = vpop.permute.xlu0 %2005 }
 0x3ce   : > { %1008 = vadd.xlane.f32.xlu0 %v1007_v62  ;;  %v987_v17 = vmul.f32 1.442695, %v956_v15  ;;  %2074 = vpow2.f32 %v985_v16  ;;  %v2731_v52 = vpop.eup %2068  ;;  %v2008_v43 = vunpack.i.h.bf16 %v2006_v45  ;;  %v2007_v44 = vunpack.i.l.bf16 %v2006_v45 }
 0x3cf   : > { %v1010_v58 = vsel %vm892_vm3, %v2731_v52, 0.0 }
 0x3d0   : > { %v2733_v14 = vpop.eup %2070  ;;  %v486_v53 = vpack.c.bf16 %v2008_v43, %v2007_v44 }
 0x3d1   : > { %v1019_v61 = vsel %vm892_vm3, %v2733_v14, 0.0 }
 0x3d2   : > { %v2737_v19 = vpop.eup %2072 }
 0x3d3   : > { %v1022_v21 = vsel %vm892_vm3, %v2737_v19, 0.0 }
 0x3d8   : > { %v2743_v22 = vpop.eup %2074 }
 0x3d9   : > { %v1031_v30 = vsel %vm892_vm3, %v2743_v22, 0.0 }
 0x3dd   : > { %2015 = vrot.lane.b32.xlu1 %v2529_v27, %s2283_s15  ;;  %s1723_s15 = sshll.u32 %s2346_s22, 8  ;;  %s1567_s22 = scalar_lea.sflag [#allocation5], %s2503_s17 }
 0x3df   : > { %v994_v18 = vpop.xlane.xlu1 %993 }
 0x3e0   : > { %2076 = vrcp.f32 %v994_v18 }
 0x3e1   : > { %2078 = vpow2.f32 %v987_v17 }
 0x3e4   : > { %2010 = vrot.lane.b32.xlu0 %v2529_v27, %s2279_s10 }
 0x3ea   : > { %v2077_v24 = vpop.eup %2076 }
 0x3eb   : > { %v2745_v25 = vpop.eup %2078  ;;  %v1054_v35 = vmul.f32 %v2077_v24, %v2664_v3 }
 0x3ec   : > { %v1034_v34 = vsel %vm892_vm3, %v2745_v25, 0.0 }
 0x3fe   : > { %v991_v55 = vpop.xlane.xlu0 %990 }
 0x3ff   : > { %2080 = vrcp.f32 %v991_v55 }
 0x401   : > { %1011 = vadd.xlane.f32.xlu1 %v1010_v58 }
 0x403   : > { %1020 = vadd.xlane.f32.xlu0 %v1019_v61 }
 0x405   : > { %1023 = vadd.xlane.f32.xlu1 %v1022_v21 }
 0x409   : > { %v2081_v20 = vpop.eup %2080  ;;  %1032 = vadd.xlane.f32.xlu1 %v1031_v30 }
 0x40a   : > { %v1053_v29 = vmul.f32 %v2081_v20, %v2673_v9 }
 0x40c   : > { %v1069_v37 = vpack.c.bf16 %v1054_v35, %v1053_v29 }
 0x40d   : > { %1035 = vadd.xlane.f32.xlu1 %v1034_v34 }
 0x40e   : > { %1812 = vmatmul.mubr.msk.bf16.vlgmr.msra.gmra.mrb[12].mxu0 %vm892_vm3, %v1069_v37 }
 0x40f   : > { %1822 = vmatpush3.bf16.msra.mxu0 %v485_v38  ;;  %1823 = vmatprep.mubr.msk.bf16.mxu0 %vm2281_vm1, %v2278_v28 }
 0x410   : > { %1833 = vmatprep.subr.bf16.mxu0 %v2278_v28 }
 0x419   : > { %2020 = vrot.lane.b32.xlu0 %v2529_v27, %s2282_s14  ;;  %s1580_s14 = sshll.u32 %s271_s28, 4  ;;  %s2811_s14 = int_to_ptr.vmem [resolvable:$true] %s1580_s14 }
 0x41e   : > { %2025 = vrot.lane.b32.xlu1 %v2529_v27, %s2284_s30 }
 0x447   : > { %v997_v3 = vpop.xlane.xlu0 %996 }
 0x448   : > { %2082 = vrcp.f32 %v997_v3 }
 0x449   : > { %v1000_v5 = vpop.xlane.xlu1 %999 }
 0x44a   : > { %2084 = vrcp.f32 %v1000_v5 }
 0x44f   : > { %v1015_v9 = vpop.xlane.xlu0 %1014 }
 0x451   : > { %v1018_v26 = vpop.xlane.xlu1 %1017 }
 0x452   : > { %v2083_v39 = vpop.eup %2082 }
 0x453   : > { %v1003_v42 = vpop.xlane.xlu0 %1002  ;;  %v1055_v48 = vmul.f32 %v2083_v39, %v2682_v31 }
 0x454   : > { %v2085_v33 = vpop.eup %2084  ;;  %2086 = vrcp.f32 %v1003_v42 }
 0x455   : > { %v1056_v41 = vmul.f32 %v2085_v33, %v2687_v36  ;;  %v1006_v46 = vpop.xlane.xlu1 %1005 }
 0x456   : > { %2088 = vrcp.f32 %v1006_v46 }
 0x457   : > { %v1027_v40 = vpop.xlane.xlu0 %1026  ;;  %v1070_v27 = vpack.c.bf16 %v1056_v41, %v1055_v48  ;;  %2090 = vrcp.f32 %v1018_v26 }
 0x458   : > { %2092 = vrcp.f32 %v1015_v9 }
 0x459   : > { %1818 = vmatmul.mubr.msk.bf16.vlgmr.msra.gmra.mrb[24].mxu1 %vm892_vm3, %v1070_v27 }
 0x45a   : > { %1828 = vmatpush3.bf16.msra.mxu1 %v486_v53  ;;  %1829 = vmatprep.mubr.msk.bf16.mxu1 %vm2281_vm1, %v2278_v28 }
 0x45b   : > { %v1009_v56 = vpop.xlane.xlu0 %1008  ;;  %1839 = vmatprep.subr.bf16.mxu1 %v2278_v28 }
 0x45e   : > { %v2087_v59 = vpop.eup %2086 }
 0x45f   : > { %v2011_v31 = vpop.permute.xlu0 %2010  ;;  %v1057_v0 = vmul.f32 %v2087_v59, %v2702_v50  ;;  %v1030_v50 = vpop.xlane.xlu1 %1029 }
 0x460   : > { %v2089_v62 = vpop.eup %2088  ;;  %v2013_v36 = vunpack.i.h.bf16 %v2011_v31  ;;  %v2012_v63 = vunpack.i.l.bf16 %v2011_v31  ;;  %2094 = vrcp.f32 %v1030_v50 }
 0x461   : > { %v1058_v1 = vmul.f32 %v2089_v62, %v2706_v51  ;;  %v2091_v6 = vpop.eup %2090  ;;  %2096 = vrcp.f32 %v1027_v40 }
 0x462   : > { %v487_v2 = vpack.c.bf16 %v2013_v36, %v2012_v63  ;;  %v2093_v7 = vpop.eup %2092  ;;  %v1062_v8 = vmul.f32 %v2091_v6, %v2698_v49  ;;  %2098 = vrcp.f32 %v1009_v56 }
 0x463   : > { %v1071_v4 = vpack.c.bf16 %v1058_v1, %v1057_v0  ;;  %v1061_v10 = vmul.f32 %v2093_v7, %v2694_v47  ;;  %v2016_v51 = vpop.permute.xlu1 %2015 }
 0x464   : > { %v2018_v30 = vunpack.i.h.bf16 %v2016_v51  ;;  %v2017_v20 = vunpack.i.l.bf16 %v2016_v51 }
 0x465   : > { %1824 = vmatmul.mubr.msk.bf16.vlgmr.msra.gmra.mrb[16].mxu0 %vm892_vm3, %v1071_v4  ;;  %v1073_v11 = vpack.c.bf16 %v1062_v8, %v1061_v10 }
 0x466   : > { %1834 = vmatpush3.bf16.msra.mxu0 %v487_v2  ;;  %1835 = vmatprep.mubr.msk.bf16.mxu0 %vm2281_vm1, %v2278_v28  ;;  %v488_v37 = vpack.c.bf16 %v2018_v30, %v2017_v20 }
 0x467   : > { %1845 = vmatprep.subr.bf16.mxu0 %v2278_v28 }
 0x46a   : > { %v2095_v49 = vpop.eup %2094 }
 0x46b   : > { %v2097_v17 = vpop.eup %2096  ;;  %v1066_v18 = vmul.f32 %v2095_v49, %v2714_v57 }
 0x46c   : > { %v2099_v58 = vpop.eup %2098  ;;  %v1065_v21 = vmul.f32 %v2097_v17, %v2710_v54 }
 0x46d   : > { %1836 = vmatmul.mubr.msk.bf16.vlgmr.msra.gmra.mrb[20].mxu0 %vm892_vm3, %v1073_v11  ;;  %v1059_v23 = vmul.f32 %v2099_v58, %v2718_v60  ;;  %v2042_v11 = vld [vmem:[#allocation8] sm:$0xff]  }
 0x46e   : > { %1847 = vmatprep.mubr.msk.bf16.mxu0 %vm2281_vm1, %v2278_v28  ;;  %v1075_v29 = vpack.c.bf16 %v1066_v18, %v1065_v21 }
 0x48e   : > { %v1012_v12 = vpop.xlane.xlu1 %1011 }
 0x48f   : > { %2100 = vrcp.f32 %v1012_v12 }
 0x490   : > { %v1021_v13 = vpop.xlane.xlu0 %1020 }
 0x492   : > { %v1024_v15 = vpop.xlane.xlu1 %1023 }
 0x493   : > { %2102 = vrcp.f32 %v1024_v15  ;;  %v2043_v15 = vld [vmem:[#allocation8 + $0x8] sm:$0xff]  }
 0x494   : > { %v2021_v16 = vpop.permute.xlu0 %2020  ;;  %2104 = vrcp.f32 %v1021_v13 }
 0x495   : > { %v2023_v47 = vunpack.i.h.bf16 %v2021_v16  ;;  %v2022_v45 = vunpack.i.l.bf16 %v2021_v16 }
 0x496   : > { %v1033_v55 = vpop.xlane.xlu1 %1032 }
 0x497   : > { %v489_v61 = vpack.c.bf16 %v2023_v47, %v2022_v45  ;;  %v2044_v47 = vld [vmem:[#allocation8 + $0x10] sm:$0xff]  }
 0x499   : > { %v2101_v24 = vpop.eup %2100  ;;  %1846 = vmatpush3.bf16.msra.mxu0 %v489_v61 }
 0x49a   : > { %v1060_v32 = vmul.f32 %v2101_v24, %v2731_v52  ;;  %v1036_v35 = vpop.xlane.xlu1 %1035  ;;  %1857 = vmatprep.subr.bf16.mxu0 %v2278_v28 }
 0x49b   : > { %2106 = vrcp.f32 %v1036_v35 }
 0x49c   : > { %1848 = vmatmul.mubr.msk.bf16.vlgmr.msra.gmra.mrb[24].mxu0 %vm892_vm3, %v1075_v29  ;;  %v1072_v57 = vpack.c.bf16 %v1060_v32, %v1059_v23  ;;  %2108 = vrcp.f32 %v1033_v55  ;;  %v2045_v55 = vld [vmem:[#allocation8 + $0x18] sm:$0xff]  }
 0x49d   : > { %v2103_v34 = vpop.eup %2102  ;;  %1865 = vmatprep.mubr.msk.bf16.mxu0 %vm2281_vm1, %v2278_v28  ;;  %1858 = vmatpush3.bf16.msra.mxu0 %v2042_v11 }
 0x49e   : > { %1830 = vmatmul.mubr.msk.bf16.vlgmr.msra.gmra.mrb[28].mxu1 %vm892_vm3, %v1072_v57  ;;  %v2026_v54 = vpop.permute.xlu1 %2025  ;;  %v2105_v60 = vpop.eup %2104  ;;  %v1064_v52 = vmul.f32 %v2103_v34, %v2737_v19  ;;  %1859 = vmatprep.subr.bf16.mxu0 %v2278_v28 }
 0x49f   : > { %1840 = vmatpush3.bf16.msra.mxu1 %v488_v37  ;;  %1841 = vmatprep.mubr.msk.bf16.mxu1 %vm2281_vm1, %v2278_v28  ;;  %v2028_v38 = vunpack.i.h.bf16 %v2026_v54  ;;  %v2027_v3 = vunpack.i.l.bf16 %v2026_v54  ;;  %v1063_v5 = vmul.f32 %v2105_v60, %v2733_v14  ;;  %v1711_v60 = vld [vmem:[%s2867_s4] ss:$0 sm:$0xff] }
 0x4a0   : > { %1851 = vmatprep.subr.bf16.mxu1 %v2278_v28 }
 0x4a1   : > { %v1074_v9 = vpack.c.bf16 %v1064_v52, %v1063_v5  ;;  %v490_v39 = vpack.c.bf16 %v2028_v38, %v2027_v3  ;;  %1860 = vmatpush3.bf16.msra.mxu0 %v2043_v15 }
 0x4a2   : > { %1861 = vmatprep.subr.bf16.mxu0 %v2278_v28 }
 0x4a5   : > { %v2107_v26 = vpop.eup %2106  ;;  %1862 = vmatpush3.bf16.msra.mxu0 %v2044_v47 }
 0x4a6   : > { %1842 = vmatmul.mubr.msk.bf16.vlgmr.msra.gmra.mrb[32].mxu1 %vm892_vm3, %v1074_v9  ;;  %v2109_v42 = vpop.eup %2108  ;;  %v1068_v33 = vmul.f32 %v2107_v26, %v2745_v25  ;;  %1863 = vmatprep.subr.bf16.mxu0 %v2278_v28 }
 0x4a7   : > { %1852 = vmatpush3.bf16.msra.mxu1 %v490_v39  ;;  %1853 = vmatprep.mubr.msk.bf16.mxu1 %vm2281_vm1, %v2278_v28  ;;  %v1067_v19 = vmul.f32 %v2109_v42, %v2743_v22 }
 0x4a9   : > { %v1076_v43 = vpack.c.bf16 %v1068_v33, %v1067_v19  ;;  %1864 = vmatpush3.bf16.msra.mxu0 %v2045_v55 }
 0x4ae   : > { %1854 = vmatmul.mubr.msk.bf16.vlgmr.msra.gmra.mrb[36].mxu1 %vm892_vm3, %v1076_v43 }
 0x4e1   : > { %v1114_v44 = vpop.f32.mrb[12].mxu0 }
 0x4e2   : > { %v1813_v48 = vpop.f32.mrb[13].mxu0 }
 0x4e3   : > { %v1117_v14 = vpop.f32.mrb[14].mxu0 }
 0x4e4   : > { %v1429_v41 = vpack.c.bf16 %v1117_v14, %v1114_v44  ;;  %v1814_v46 = vpop.f32.mrb[15].mxu0 }
 0x4e6   : > { %1430 = vst.msk [vmem:[#allocation2] sm:$0xff] %vm494_vm2, %v1429_v41 }
 0x52c   : > { %v1158_v40 = vpop.f32.mrb[24].mxu1 }
 0x52d   : > { %v1819_v27 = vpop.f32.mrb[25].mxu1 }
 0x52e   : > { %v1161_v53 = vpop.f32.mrb[26].mxu1 }
 0x52f   : > { %v1431_v56 = vpack.c.bf16 %v1161_v53, %v1158_v40  ;;  %v1820_v59 = vpop.f32.mrb[27].mxu1 }
 0x531   : > { %1433 = vrot.lane.b32.xlu0 %v1431_v56, %s2286_s23 }
 0x538   : > { %v1202_v25 = vpop.f32.mrb[16].mxu0 }
 0x539   : > { %v1825_v22 = vpop.f32.mrb[17].mxu0 }
 0x53a   : > { %v1205_v31 = vpop.f32.mrb[18].mxu0 }
 0x53b   : > { %v1438_v62 = vpack.c.bf16 %v1205_v31, %v1202_v25  ;;  %v1826_v36 = vpop.f32.mrb[19].mxu0 }
 0x53d   : > { %1440 = vrot.lane.b32.xlu1 %v1438_v62, %s2287_s7  ;;  %s2817_s7 = scalar_lea.hbm %s2868_s5, %s1723_s15 }
 0x540   : > { %v1290_v63 = vpop.f32.mrb[20].mxu0 }
 0x541   : > { %v1837_v0 = vpop.f32.mrb[21].mxu0 }
 0x542   : > { %v1293_v1 = vpop.f32.mrb[22].mxu0 }
 0x543   : > { %v1452_v2 = vpack.c.bf16 %v1293_v1, %v1290_v63  ;;  %v1838_v4 = vpop.f32.mrb[23].mxu0 }
 0x545   : > { %1454 = vrot.lane.b32.xlu1 %v1452_v2, %s2288_s6  ;;  %s2196_s6 = scalar_lea.vmem %s2811_s14, 256 }
 0x546   : > { %p2197_p8 = scmp.ne.s32.totalorder %s2811_s14, %s2196_s6 }
 0x548   : > { %p2198_p1 = pnand %p2197_p8, %p2882_p0 }
 0x54a   : > { %p2199_p3 = pneg %p2198_p1 }
 0x56f   : > { %v1378_v6 = vpop.f32.mrb[24].mxu0 }
 0x570   : > { %v1849_v7 = vpop.f32.mrb[25].mxu0 }
 0x571   : > { %v1246_v8 = vpop.f32.mrb[28].mxu1  ;;  %v1381_v10 = vpop.f32.mrb[26].mxu0 }
 0x572   : > { %v1466_v50 = vpack.c.bf16 %v1381_v10, %v1378_v6  ;;  %v1831_v51 = vpop.f32.mrb[29].mxu1  ;;  %v1850_v12 = vpop.f32.mrb[27].mxu0 }
 0x573   : > { %v1249_v13 = vpop.f32.mrb[30].mxu1 }
 0x574   : > { %v1445_v49 = vpack.c.bf16 %v1249_v13, %v1246_v8  ;;  %v1832_v16 = vpop.f32.mrb[31].mxu1  ;;  %1468 = vrot.lane.b32.xlu1 %v1466_v50, %s2289_s8  ;;  %s2293_s8 = smov [#allocation9]  }
 0x576   : > { %1447 = vrot.lane.b32.xlu0 %v1445_v49, %s2290_s9  ;;  %s2200_s9 = sshll.u32 %s2293_s8, 4  ;;  %s2201_s9 = int_to_ptr.vmem [resolvable:$false] %s2200_s9 }
 0x577   : > { %p2203_p5 = scmp.lt.s32.totalorder %s2811_s14, %s2201_s9 }
 0x579   : > { %v1334_v17 = vpop.f32.mrb[32].mxu1 }
 0x57a   : > { %v1843_v45 = vpop.f32.mrb[33].mxu1 }
 0x57b   : > { %v1337_v18 = vpop.f32.mrb[34].mxu1 }
 0x57c   : > { %v1459_v58 = vpack.c.bf16 %v1337_v18, %v1334_v17  ;;  %v1844_v61 = vpop.f32.mrb[35].mxu1 }
 0x57e   : > { %1461 = vrot.lane.b32.xlu0 %v1459_v58, %s2291_s24  ;;  %s2202_s24 = scalar_lea.vmem %s2201_s9, 512 }
 0x57f   : > { %p2204_p9 = scmp.lt.s32.totalorder %s2202_s24, %s2196_s6 }
 0x581   : > { %v1422_v21 = vpop.f32.mrb[36].mxu1  ;;  %p2205_p12 = por %p2204_p9, %p2203_p5 }
 0x582   : > { %v1855_v24 = vpop.f32.mrb[37].mxu1 }
 0x583   : > { %v1425_v30 = vpop.f32.mrb[38].mxu1  ;;  %p2206_p2 = pnand %p2205_p12, %p2199_p3 }
 0x584   : > { %v1473_v20 = vpack.c.bf16 %v1425_v30, %v1422_v21  ;;  %v1856_v23 = vpop.f32.mrb[39].mxu1 }
 0x586   : > { %1475 = vrot.lane.b32.xlu0 %v1473_v20, %s2292_s26 }
 0x5a3   : > { %v1434_v32 = vpop.permute.xlu0 %1433 }
 0x5a4   : > { %1437 = vst.msk [vmem:[#allocation2] sm:$0xff] %vm1436_vm4, %v1434_v32 }
 0x5af   : > { %v1441_v35 = vpop.permute.xlu1 %1440 }
 0x5b0   : > { %1444 = vst.msk [vmem:[#allocation2] sm:$0xff] %vm1443_vm5, %v1441_v35 }
 0x5b7   : > { %v1455_v29 = vpop.permute.xlu1 %1454 }
 0x5e6   : > { %v1469_v34 = vpop.permute.xlu1 %1468 }
 0x5e8   : > { %v1448_v28 = vpop.permute.xlu0 %1447 }
 0x5e9   : > { %1451 = vst.msk [vmem:[#allocation2] sm:$0xff] %vm1450_vm6, %v1448_v28 }
 0x5ea   : > { %1458 = vst.msk [vmem:[#allocation2] sm:$0xff] %vm1457_vm7, %v1455_v29 }
 0x5f0   : > { %v1462_v57 = vpop.permute.xlu0 %1461 }
 0x5f1   : > { %1465 = vst.msk [vmem:[#allocation2] sm:$0xff] %vm1464_vm8, %v1462_v57 }
 0x5f2   : > { %1472 = vst.msk [vmem:[#allocation2] sm:$0xff] %vm1471_vm9, %v1469_v34 }
 0x5f8   : > { %v1476_v37 = vpop.permute.xlu0 %1475 }
 0x5f9   : > { %1479 = vst.msk [vmem:[#allocation2] sm:$0xff] %vm1478_vm10, %v1476_v37 }
 0x600   : > { %v1480_v54 = vld [vmem:[#allocation2] sm:$0xff] }
 0x601   : > { %1866 = vmatmul.mubr.msk.bf16.vlgmr.msra.gmra.mrb[28].mxu0 %vm340_vm0, %v1480_v54 }
 0x6d4   : > { %v1557_v52 = vpop.f32.mrb[28].mxu0 }
 0x6d5   : > { %v1558_v38 = vadd.f32 %v1711_v60, %v1557_v52  ;;  %v1867_v3 = vpop.f32.mrb[29].mxu0 }
 0x6d6   : > { %v1560_v5 = vpop.f32.mrb[30].mxu0 }
 0x6d7   : > { %1564 = vst.msk [vmem:[%s271_s28] sm:$0xff] %vm340_vm0, %v1558_v38  ;;  %v1561_v9 = vadd.f32 %v1711_v60, %v1560_v5  ;;  %v1868_v26 = vpop.f32.mrb[31].mxu0 }
 0x6d9   : > { %1565 = vst.msk [vmem:[%s271_s28 + $0x8] sm:$0xff] %vm340_vm0, %v1561_v9 }
 0x6da   : > { %2209 = shalt.err (!%p2206_p2)
}
 0x6db   : > { %s2210_s26 = scalar_lea.hbm %s2817_s7, 256  ;;  %s2214_s10 = scalar_lea.hbm %s2868_s5, 512 }
 0x6dc   : > { %p2211_p13 = scmp.ne.s32.totalorder %s2817_s7, %s2210_s26  ;;  %p2215_p4 = scmp.lt.u32.totalorder %s2817_s7, %s2868_s5 }
 0x6dd   : > { %p2216_p7 = scmp.lt.u32.totalorder %s2214_s10, %s2210_s26  ;;  %p2218_p8 = scmp.lt.u32.totalorder %s2210_s26, %s2817_s7 }
 0x6de   : > { %p2212_p6 = pnand %p2211_p13, %p2882_p0 }
 0x6df   : > { %p2217_p11 = por %p2216_p7, %p2215_p4 }
 0x6e0   : > { %p2213_p10 = pneg %p2212_p6 }
 0x6e1   : > { %p2219_p1 = por %p2218_p8, %p2217_p11 }
 0x6e3   : > { %p2220_p3 = pnand %p2219_p1, %p2213_p10 }
 0x6e5   : > { %2223 = shalt.err (!%p2220_p3)
}
 0x6e6   : > { %s2294_s30 = smov 128  }
 0x6e7   : > { %1879 = dma.vmem_to_hbm [thread:$0]  (%p2882_p0), %s2811_s14, 256, %s2817_s7, %s1567_s22, %s2294_s30, %s2294_s30, %s2286_s23  }
 0x6e8 PF: > { %s1595_s11 = sand.u32 1, %s2254_s18   ;;  %p2883_p5 = scmp.ne.s32.totalorder %s2873_s25, 0 }
 0x6e9   : > { %p2884_p9 = scmp.ge.s32.totalorder %s2266_s21, 2  ;;  %s1596_s6 = scalar_lea.sflag [#allocation5], %s1595_s11 }
 0x6eb   : > { %p1893_p12 = pnand %p2884_p9, %p2883_p5 }
 0x6ed   : > { %2249 = dma.done.wait (!%p1893_p12), %s1596_s6, 256  }
 0x6ee   : > { %2251 = vsyncadd (!%p1893_p12), %s1596_s6, 4294967040  ;;  %p19_p2 = scmp.ge.s32.totalorder %s2438_s16, 4   ;;  %s2885_s18 = smov %s2258_s19 }
 0x6ef   : > { %s2886_s19 = smov %s2262_s20  ;;  %s2887_s20 = smov %s2447_s27 }
 0x6f0   : > { %s2888_s21 = smov %s2438_s16  ;;  %21 = sbr.rel (!%p19_p2) target bundleno = 6 (0x6), region = 93 }
 0x6f7   :  { %1601 = vsyncpa [#allocation4], 1 }
 0x6f8   :  { %1603 = vsyncpa [#allocation4 + $0x1], 1 }
 0x6f9   :  { %1604 = vsyncpa [#allocation7], 1 }
 0x6fa   :  { %1605 = vsyncpa [#allocation5], 1 }
 0x6fb   :  { %1607 = vsyncpa [#allocation5 + $0x1], 1 }

</bundles_post_ra>
